<compile_context>
chip_gen: v6e
topology: v6e:2x2x1
jax: 0.10.0
libtpu: 0.0.40
codegen_flags: <defaults>
</compile_context>

<pallas_src>
import jax
import jax.numpy as jnp
from jax.experimental import pallas as pl
from jax.experimental.pallas import tpu as pltpu


def _round_up(x: int, m: int) -> int:
    return (x + m - 1) // m * m


def _vmem_limit_bytes() -> int:
    """Per-generation VMEM budget (conservative fallback = 64 MiB / v7x)."""
    cap = 64 * 1024 * 1024
    try:
        info = pltpu.get_tpu_info()
        cap = int(getattr(info, "vmem_capacity_bytes", cap)) or cap
    except Exception:
        pass
    # Leave headroom for compiler scratch: ~96 MiB on 128 MiB chips, ~48 MiB on v7x.
    return min(int(cap * 0.75), 100 * 1024 * 1024)


def _pick_tile(dim: int, desired: int, align: int):
    """Pick a tile for `dim`: full dim if it fits in one tile (no padding),
    else an `align`-multiple <= desired that divides the (minimally) padded dim."""
    if dim <= max(desired, align):
        return dim, dim                       # single full-dim block, no padding
    dp = dim if dim % align == 0 else _round_up(dim, align)
    t = max(align, (desired // align) * align)
    while t > align and dp % t != 0:
        t -= align
    return t, dp


# ----------------------------------------------------------------------------
# Kernels
# ----------------------------------------------------------------------------
def _proj_kernel(x_ref, w_ref, b_ref, o_ref):
    """Full-K resident: o = relu(x @ w + b) for one (tm, tn) output tile.

    x_ref: [tm, K]   activation tile (full reduction dim)
    w_ref: [K,  tn]  weight column panel (pre-transposed, lane-dense)
    b_ref: [1,  tn]  bias tile
    o_ref: [tm, tn]  output tile
    """
    acc = jnp.dot(x_ref[...], w_ref[...], preferred_element_type=jnp.float32)
    acc = acc + b_ref[...].astype(jnp.float32)
    o_ref[...] = jnp.maximum(acc, 0.0).astype(o_ref.dtype)


def _proj_kernel_split_k(x_ref, w_ref, b_ref, o_ref, acc_ref):
    """Fallback for very large K: accumulate over the K grid axis."""
    k = pl.program_id(2)
    part = jnp.dot(x_ref[...], w_ref[...], preferred_element_type=jnp.float32)

    @pl.when(k == 0)
    def _first():
        acc_ref[...] = part          # direct write: no zero-fill + first add

    @pl.when(k != 0)
    def _accum():
        acc_ref[...] += part

    @pl.when(k == pl.num_programs(2) - 1)
    def _finalize():
        acc = acc_ref[...] + b_ref[...].astype(jnp.float32)
        o_ref[...] = jnp.maximum(acc, 0.0).astype(o_ref.dtype)


# ----------------------------------------------------------------------------
# Wrapper
# ----------------------------------------------------------------------------
@jax.jit
def feature_projection(x, weight, bias):
    """relu(x @ weight.T + bias) -- semantics of nn.Linear + nn.ReLU.

    x:      [..., in_features]
    weight: [intermediate_features, in_features]   (PyTorch layout)
    bias:   [intermediate_features]
    """
    K = x.shape[-1]
    N = weight.shape[0]
    lead_shape = x.shape[:-1]

    x2d = x.reshape(-1, K)                 # [M, K]
    M = x2d.shape[0]

    wT = weight.T                          # [K, N] one-time layout plumbing
    b2d = bias.reshape(1, N)

    xb = x2d.dtype.itemsize
    wb = wT.dtype.itemsize
    ob = x2d.dtype.itemsize
    budget = _vmem_limit_bytes()

    def resident_fits(tm, tn):
        # double-buffered x tile + w panel + out tile + bias
        foot = 2 * tm * K * xb + 2 * K * tn * wb + 2 * tm * tn * ob + 2 * tn * 4
        return foot <= int(budget * 0.8)

    use_resident = resident_fits(min(128, _round_up(M, 8)), 128)

    if use_resident:
        # ---- primary path: whole K resident in VMEM, grid = (N tiles, M tiles)
        dtm, dtn = 512, 512
        while (not resident_fits(min(dtm, _round_up(M, 8)),
                                 min(dtn, _round_up(N, 128)))
               and (dtm > 8 or dtn > 128)):
            if dtm >= dtn and dtm > 8:
                dtm = max(8, dtm // 2)
            else:
                dtn = max(128, dtn // 2)

        tm, Mp = _pick_tile(M, dtm, 8)
        tn, Np = _pick_tile(N, dtn, 128)

        # Megacore (v7x): make sure at least one parallel axis has >= 2 blocks.
        if (Mp // tm == 1) and (Np // tn == 1) and Np >= 256 and Np % 256 == 0:
            tn = Np // 2

        xp = x2d if Mp == M else jnp.pad(x2d, ((0, Mp - M), (0, 0)))
        wp = wT if Np == N else jnp.pad(wT, ((0, 0), (0, Np - N)))
        bp = b2d if Np == N else jnp.pad(b2d, ((0, 0), (0, Np - N)))

        grid_m, grid_n = Mp // tm, Np // tn
        grid = (grid_n, grid_m)  # M axis innermost -> each weight panel DMA'd once

        cost = pl.CostEstimate(
            flops=2 * M * K * N,
            transcendentals=0,
            bytes_accessed=(xp.size * xb * grid_n       # x re-streamed per N tile
                            + wp.size * wb              # weight read once
                            + bp.size * bp.dtype.itemsize
                            + Mp * Np * ob),
        )

        out2d = pl.pallas_call(
            _proj_kernel,
            out_shape=jax.ShapeDtypeStruct((Mp, Np), x.dtype),
            grid_spec=pltpu.PrefetchScalarGridSpec(
                num_scalar_prefetch=0,
                grid=grid,
                in_specs=[
                    pl.BlockSpec((tm, K), lambda j, i: (i, 0)),   # x tile
                    pl.BlockSpec((K, tn), lambda j, i: (0, j)),   # weight panel
                    pl.BlockSpec((1, tn), lambda j, i: (0, j)),   # bias tile
                ],
                out_specs=pl.BlockSpec((tm, tn), lambda j, i: (i, j)),
            ),
            compiler_params=pltpu.CompilerParams(
                dimension_semantics=("parallel", "parallel"),
                vmem_limit_bytes=budget,
            ),
            cost_estimate=cost,
        )(xp, wp, bp)
    else:
        # ---- fallback: split-K accumulator path (very large in_features only)
        tm = min(512, _round_up(M, 8))
        tn = min(256, _round_up(N, 128))
        tk = min(1024, _round_up(K, 128))
        Mp, Np, Kp = _round_up(M, tm), _round_up(N, tn), _round_up(K, tk)

        xp = x2d if (Mp == M and Kp == K) else jnp.pad(
            x2d, ((0, Mp - M), (0, Kp - K)))
        wp = wT if (Np == N and Kp == K) else jnp.pad(
            wT, ((0, Kp - K), (0, Np - N)))
        bp = b2d if Np == N else jnp.pad(b2d, ((0, 0), (0, Np - N)))

        grid = (Mp // tm, Np // tn, Kp // tk)

        cost = pl.CostEstimate(
            flops=2 * M * K * N,
            transcendentals=0,
            bytes_accessed=(xp.size * xb * (Np // tn)
                            + wp.size * wb * (Mp // tm)
                            + bp.size * bp.dtype.itemsize
                            + Mp * Np * ob),
        )

        out2d = pl.pallas_call(
            _proj_kernel_split_k,
            out_shape=jax.ShapeDtypeStruct((Mp, Np), x.dtype),
            grid_spec=pltpu.PrefetchScalarGridSpec(
                num_scalar_prefetch=0,
                grid=grid,
                in_specs=[
                    pl.BlockSpec((tm, tk), lambda i, j, k: (i, k)),   # x tile
                    pl.BlockSpec((tk, tn), lambda i, j, k: (k, j)),   # weight tile
                    pl.BlockSpec((1, tn), lambda i, j, k: (0, j)),    # bias tile
                ],
                out_specs=pl.BlockSpec((tm, tn), lambda i, j, k: (i, j)),
                scratch_shapes=[pltpu.VMEM((tm, tn), jnp.float32)],
            ),
            compiler_params=pltpu.CompilerParams(
                dimension_semantics=("parallel", "parallel", "arbitrary"),
                vmem_limit_bytes=budget,
            ),
            cost_estimate=cost,
        )(xp, wp, bp)

    if out2d.shape != (M, N):
        out2d = out2d[:M, :N]
    return out2d.reshape(*lead_shape, N)


if __name__ == "__main__":
    # Small shapes consistent with the module: batch=2, seq=8, in=32, inter=64
    batch, seq, in_features, intermediate_features = 2, 8, 32, 64

    key = jax.random.PRNGKey(0)
    kx, kw, kb = jax.random.split(key, 3)

    x = jax.random.normal(kx, (batch, seq, in_features), dtype=jnp.float32)
    bound = 1.0 / (in_features ** 0.5)
    weight = jax.random.uniform(
        kw, (intermediate_features, in_features), jnp.float32, -bound, bound
    )
    bias = jax.random.uniform(
        kb, (intermediate_features,), jnp.float32, -bound, bound
    )

    out = feature_projection(x, weight, bias)
    out = jax.block_until_ready(out)

    # Reference check in plain JAX
    ref = jnp.maximum(jnp.einsum("bsk,nk->bsn", x, weight) + bias, 0.0)
    assert out.shape == (batch, seq, intermediate_features)
    assert jnp.allclose(out, ref, atol=1e-5, rtol=1e-5)

    print("KERNEL_OK")
</pallas_src>

<mosaic_0001>
module attributes {stable_mosaic.version = 11 : i64} {
  func.func @_proj_kernel(%arg0: i32, %arg1: i32, %arg2: memref<16x32xf32, #tpu.memory_space<vmem>>, %arg3: memref<32x64xf32, #tpu.memory_space<vmem>>, %arg4: memref<1x64xf32, #tpu.memory_space<vmem>>, %arg5: memref<16x64xf32, #tpu.memory_space<vmem>>) attributes {dimension_semantics = [#tpu.dimension_semantics<parallel>, #tpu.dimension_semantics<parallel>], iteration_bounds = array<i64: 1, 1>, scalar_prefetch = 0 : i64, scratch_operands = 0 : i64, tpu.core_type = #tpu.core_type<tc>, window_params = [{transform_indices = @transform_0, window_bounds = array<i64: 16, 32>}, {transform_indices = @transform_1, window_bounds = array<i64: 32, 64>}, {transform_indices = @transform_2, window_bounds = array<i64: 1, 64>}, {transform_indices = @transform_3, window_bounds = array<i64: 16, 64>}]} {
    %c0 = arith.constant 0 : index
    %c0_0 = arith.constant 0 : index
    %0 = vector.load %arg2[%c0, %c0_0] : memref<16x32xf32, #tpu.memory_space<vmem>>, vector<16x32xf32>
    %c0_1 = arith.constant 0 : index
    %c0_2 = arith.constant 0 : index
    %1 = vector.load %arg3[%c0_1, %c0_2] : memref<32x64xf32, #tpu.memory_space<vmem>>, vector<32x64xf32>
    %cst = arith.constant dense<0.000000e+00> : vector<16x64xf32>
    %2 = tpu.matmul %0, %1, %cst {dimension_numbers = #tpu.dot_dimension_numbers<[1], [0], [0], [1], [0, 0, 1, 1], [], []>} : vector<16x32xf32>, vector<32x64xf32>, vector<16x64xf32> -> vector<16x64xf32>
    %c0_3 = arith.constant 0 : index
    %c0_4 = arith.constant 0 : index
    %3 = vector.load %arg4[%c0_3, %c0_4] : memref<1x64xf32, #tpu.memory_space<vmem>>, vector<1x64xf32>
    %4 = vector.broadcast %3 : vector<1x64xf32> to vector<16x64xf32>
    %5 = arith.addf %2, %4 : vector<16x64xf32>
    %cst_5 = arith.constant 0.000000e+00 : f32
    %6 = vector.broadcast %cst_5 : f32 to vector<16x64xf32>
    %7 = arith.maximumf %5, %6 : vector<16x64xf32>
    %c0_6 = arith.constant 0 : index
    %c0_7 = arith.constant 0 : index
    %8 = vector.load %arg5[%c0_6, %c0_7] : memref<16x64xf32, #tpu.memory_space<vmem>>, vector<16x64xf32>
    tpu.vector_store %arg5[%c0_6, %c0_7], %7 {strides = array<i32>} : memref<16x64xf32, #tpu.memory_space<vmem>>, vector<16x64xf32>,
    return
  }
  func.func @transform_0(%arg0: i32, %arg1: i32) -> (i32, i32) {
    %c0_i32 = arith.constant 0 : i32
    %c0_i32_0 = arith.constant 0 : i32
    return %arg1, %c0_i32 : i32, i32
  }
  func.func @transform_1(%arg0: i32, %arg1: i32) -> (i32, i32) {
    %c0_i32 = arith.constant 0 : i32
    %c0_i32_0 = arith.constant 0 : i32
    return %c0_i32, %arg0 : i32, i32
  }
  func.func @transform_2(%arg0: i32, %arg1: i32) -> (i32, i32) {
    %c0_i32 = arith.constant 0 : i32
    %c0_i32_0 = arith.constant 0 : i32
    return %c0_i32, %arg0 : i32, i32
  }
  func.func @transform_3(%arg0: i32, %arg1: i32) -> (i32, i32) {
    %c0_i32 = arith.constant 0 : i32
    return %arg1, %arg0 : i32, i32
  }
}

</mosaic_0001>

<bundles_post_ra>
// kernel: feature_projection.1
= control target key start
LH: loop header
LB: loop body
LE: loop exit
PB: predicated region body
PF: predicated region fallthrough
CT: control target
= control target key end

     0   :  { %8 = vsyncpa [#allocation3], 0  ;;  %s300_s0 = inlined_call_operand.hbm [shape: f32[16,32], index: 0, kind: input, shape index: {}]   ;;  %s301_s1 = inlined_call_operand.hbm [shape: f32[32,64], index: 1, kind: input, shape index: {}]   ;;  %s302_s2 = inlined_call_operand.vmem [shape: f32[1,64], index: 2, kind: input, shape index: {}]   ;;  %s303_s3 = inlined_call_operand.hbm [shape: f32[16,64], index: 3, kind: output, shape index: {}]  }
   0x1   :  { %9 = vsyncpa [#allocation6], 0 }
   0x2   :  { %10 = vsyncpa [#allocation4], 0  ;;  %s252_s12 = smov [#allocation2]  }
   0x3   :  { %s16_s13 = sshll.u32 %s252_s12, 4  ;;  %s17_s13 = int_to_ptr.vmem [resolvable:$true] %s16_s13 }
   0x4   :  { %s194_s14 = scalar_lea.vmem %s17_s13, 256  ;;  %p199_p1 = scmp.lt.s32.totalorder %s17_s13, %s17_s13 }
   0x5   :  { %p195_p0 = scmp.ne.s32.totalorder %s17_s13, %s194_s14  ;;  %p200_p2 = scmp.lt.s32.totalorder %s194_s14, %s194_s14 }
   0x7   :  { %p201_p3 = por %p200_p2, %p199_p1 }
   0x9   :  { %p202_p4 = pnand %p201_p3, %p195_p0 }
   0xb   :  { %205 = shalt.err (!%p202_p4)
}
   0xc   :  { %s253_s15 = smov 128   ;;  %s254_s16 = smov 8  }
   0xd   :  { %22 = dma.hbm_to_vmem [thread:$0]  %s300_s0, 256, %s17_s13, [#allocation3], %s253_s15, %s253_s15, %s254_s16  }
   0xe   :  { %s255_s19 = smov [#allocation5]  }
   0xf   :  { %s28_s20 = sshll.u32 %s255_s19, 4  ;;  %s29_s20 = int_to_ptr.vmem [resolvable:$true] %s28_s20 }
  0x10   :  { %s214_s21 = scalar_lea.vmem %s29_s20, 512  ;;  %p219_p6 = scmp.lt.s32.totalorder %s29_s20, %s29_s20 }
  0x11   :  { %p215_p5 = scmp.ne.s32.totalorder %s29_s20, %s214_s21  ;;  %p220_p7 = scmp.lt.s32.totalorder %s214_s21, %s214_s21 }
  0x13   :  { %p221_p8 = por %p220_p7, %p219_p6 }
  0x15   :  { %p222_p9 = pnand %p221_p8, %p215_p5 }
  0x17   :  { %225 = shalt.err (!%p222_p9)
}
  0x18   :  { %34 = dma.hbm_to_vmem [thread:$0]  %s301_s1, 512, %s29_s20, [#allocation6], %s253_s15, %s253_s15, %s254_s16  }
  0x19   :  { %246 = dma.done.wait [#allocation3], 256  }
  0x1a   :  { %247 = vsyncadd [#allocation3], 4294967040 }
  0x1b   :  { %248 = dma.done.wait [#allocation6], 512  }
  0x1c   :  { %249 = vsyncadd [#allocation6], 4294966784  ;;  %vm56_vm0 = vcmask 261120   ;;  %v48_v0 = vld [vmem:[#allocation5 + $0x18] sm:$0xff]  ;;  %v47_v1 = vld [vmem:[#allocation5 + $0x10] sm:$0xff]  ;;  %vm140_vm1 = vcmask 523264  }
  0x1d   :  { %170 = vmatprep.subr.mxu0 %v48_v0  ;;  %v43_v2 = vld [vmem:[#allocation2] sm:$0xff]  ;;  %v46_v3 = vld [vmem:[#allocation5 + $0x8] sm:$0xff]  ;;  %v45_v4 = vld [vmem:[#allocation5] sm:$0xff]  ;;  %s256_s24 = smov [#allocation7]  }
  0x1e   :  { %171 = vmatpush3.msra.mxu0 %v48_v0  ;;  %178 = vmatprep.mubr.msk.f32.mxu0 %vm56_vm0, %v43_v2  ;;  %v44_v5 = vld [vmem:[#allocation2 + $0x8] sm:$0xff]  ;;  %v161_v6 = vld [vmem:[%s302_s2] ss:$0 sm:$0xff]  ;;  %s148_s25 = sshll.u32 %s256_s24, 4  ;;  %s149_s25 = int_to_ptr.vmem [resolvable:$true] %s148_s25 }
  0x1f   :  { %172 = vmatprep.subr.mxu0 %v47_v1  ;;  %s226_s26 = scalar_lea.vmem %s149_s25, 256  ;;  %p231_p11 = scmp.lt.s32.totalorder %s149_s25, %s149_s25 }
  0x20   :  { %173 = vmatpush3.msra.mxu0 %v47_v1  ;;  %p227_p10 = scmp.ne.s32.totalorder %s149_s25, %s226_s26  ;;  %p232_p12 = scmp.lt.s32.totalorder %s226_s26, %s226_s26 }
  0x21   :  { %174 = vmatprep.subr.mxu0 %v46_v3 }
  0x22   :  { %175 = vmatpush3.msra.mxu0 %v46_v3  ;;  %p233_p13 = por %p232_p12, %p231_p11 }
  0x23   :  { %176 = vmatprep.subr.mxu0 %v45_v4 }
  0x24   :  { %177 = vmatpush3.msra.mxu0 %v45_v4  ;;  %p234_p0 = pnand %p233_p13, %p227_p10 }
  0x25   :  { %179 = vmatmul.mubr.msk.f32.vlgmr.msra.gmra.mxu0 %vm56_vm0, %v44_v5 }
  0xe5   :  { %v180_v7 = vpop.f32.mrf.mxu0 }
  0xe6   :  { %v135_v8 = vadd.f32 %v180_v7, %v161_v6 }
  0xe7   :  { %v129_v9 = vpop.f32.mrf.mxu0 }
  0xe8   :  { %v139_v10 = vmax.f32 %v135_v8, 0.0  ;;  %v130_v11 = vadd.f32 %v161_v6, %v129_v9 }
  0xea   :  { %v138_v12 = vmax.f32 %v130_v11, 0.0  ;;  %142 = vst.msk [vmem:[#allocation7 + $0x8] sm:$0xff] %vm140_vm1, %v139_v10 }
  0xec   :  { %141 = vst.msk [vmem:[#allocation7] sm:$0xff] %vm140_vm1, %v138_v12 }
  0xed   :  { %237 = shalt.err (!%p234_p0)
}
  0xee   :  { %154 = dma.vmem_to_hbm [thread:$0]  %s149_s25, 256, %s303_s3, [#allocation4], %s253_s15, %s253_s15, %s254_s16  }
  0xef   :  { %250 = dma.done.wait [#allocation4], 256  }
  0xf0   :  { %251 = vsyncadd [#allocation4], 4294967040 }
  0xf1   :  { %158 = vsyncpa [#allocation3], 1 }
  0xf2   :  { %159 = vsyncpa [#allocation6], 1 }
  0xf3   :  { %160 = vsyncpa [#allocation4], 1 }

</bundles_post_ra>
